<compile_context>
chip_gen: v6e
topology: v6e:2x2x1
jax: 0.10.0
libtpu: 0.0.40
codegen_flags: <defaults>
</compile_context>

<pallas_src>
import functools

import jax
import jax.numpy as jnp
from jax import lax
from jax.experimental import pallas as pl
from jax.experimental.pallas import tpu as pltpu


def _round_up(x, m):
    return ((x + m - 1) // m) * m


def _vmem_capacity_bytes():
    try:
        return int(pltpu.get_tpu_info().vmem_capacity_bytes)
    except Exception:
        return 64 << 20  # conservative fallback: v7x per-TensorCore physical VMEM


# ----------------------------- Pallas kernel ------------------------------ #
def _tcn_kernel(x_ref, xh_ref, w_ref, shift_ref, o_ref, comb_ref, gath_ref,
                *, K, stride, cin_p, v, tm, halo_pad):
    # x_ref:     (1, s*Cin_p, TM)        main lane tile (stride-residue-grouped, bf16)
    # xh_ref:    (1, s*Cin_p, halo_pad)  halo lanes just past the tile boundary (bf16)
    # w_ref:     (Cout_p, K*Cin_p)       BN-scale-folded fused conv weights (bf16)
    # shift_ref: (Cout_p, 1)             folded conv-bias / BN shift (f32)
    # o_ref:     (1, Cout_p, TM)         lane-dense f32 output tile
    # comb_ref:  (s*Cin_p, TM+halo_pad)  scratch: contiguous main+halo lane window
    # gath_ref:  (K*Cin_p, TM)           scratch: K shifted tap slices, ready for one matmul
    #
    # Stitch main tile + halo into one contiguous lane window (both stores 128-lane aligned).
    comb_ref[:, pl.ds(0, tm)] = x_ref[0]
    comb_ref[:, pl.ds(tm, halo_pad)] = xh_ref[0]
    # Gather the K temporal taps (static lane offsets, aligned full-width stores) so the conv
    # becomes a single K*Cin-wide-contraction MXU matmul instead of K small Cin-wide dots.
    for k in range(K):
        r = k % stride                  # stride-residue plane this tap reads
        off = (k // stride) * v         # static lane offset of this tap inside the plane
        gath_ref[pl.ds(k * cin_p, cin_p), :] = \
            comb_ref[pl.ds(r * cin_p, cin_p), pl.ds(off, tm)]
    acc = jnp.dot(w_ref[...], gath_ref[...], preferred_element_type=jnp.float32)
    o_ref[0, :, :] = (acc + shift_ref[...]).astype(o_ref.dtype)


# ----------------------------- unit_tcn module ---------------------------- #
class UnitTCN:
    """JAX/Pallas re-implementation of unit_tcn.forward (conv(K,1) + BN, inference-form BN)."""

    def __init__(self, in_channels, out_channels, kernel_size=9, stride=1, key=None,
                 compute_dtype=jnp.bfloat16, lane_tile=1024):
        self.in_channels = in_channels
        self.out_channels = out_channels
        self.kernel_size = kernel_size
        self.stride = stride
        self.pad = (kernel_size - 1) // 2
        self.compute_dtype = compute_dtype
        self.lane_tile = lane_tile  # target TM (lanes per tile); bump to 2048 on v6e/v7x

        key = jax.random.PRNGKey(0) if key is None else key
        # kaiming_normal_(mode='fan_out'): std = sqrt(2 / fan_out), fan_out = Cout * K * 1
        fan_out = out_channels * kernel_size * 1
        std = (2.0 / fan_out) ** 0.5
        # conv weight layout matches PyTorch: (Cout, Cin, K, 1)
        self.conv_w = std * jax.random.normal(
            key, (out_channels, in_channels, kernel_size, 1), dtype=jnp.float32)
        self.conv_b = jnp.zeros((out_channels,), jnp.float32)  # conv_init: bias = 0

        # bn_init(bn, 1): gamma = 1, beta = 0; fresh running stats: mean = 0, var = 1
        self.bn_gamma = jnp.ones((out_channels,), jnp.float32)
        self.bn_beta = jnp.zeros((out_channels,), jnp.float32)
        self.bn_mean = jnp.zeros((out_channels,), jnp.float32)
        self.bn_var = jnp.ones((out_channels,), jnp.float32)
        self.bn_eps = 1e-5

    def __call__(self, x):
        # x: NCHW = (N, Cin, T, V)
        N, Cin, T, V = x.shape
        K, pad, s = self.kernel_size, self.pad, self.stride
        Cout = self.out_channels
        cdt = self.compute_dtype

        T_p = T + 2 * pad
        T_out = (T_p - K) // s + 1
        assert T_out >= 1
        M_out = T_out * V

        cin_p = _round_up(Cin, 16)          # bf16 sublane-packing friendly channel padding
        cout_p = _round_up(Cout, 8)
        Cg = s * cin_p

        # Lane tiling of M = T_out*V, with a small halo block past each tile boundary.
        halo_lanes = ((K - 1) // s) * V
        halo_pad = _round_up(max(halo_lanes, 1), 128)
        tm = min(_round_up(self.lane_tile, halo_pad), _round_up(M_out, halo_pad))
        if tm <= halo_lanes:                # keep every tap's window inside main+halo blocks
            tm = _round_up(halo_lanes + 1, halo_pad)
        n_tiles = -(-M_out // tm)
        Mo = n_tiles * tm

        T_pp = _round_up(T_p, s)
        T_res = T_pp // s
        Lp = max(Mo + halo_pad, _round_up(T_res * V, 128))

        # Repack: zero-pad channels + time, regroup time by stride residue, flatten (T', V)
        # into lanes, zero-pad lanes, cast to bf16 — all in one fused wrapper copy.
        # TODO(synk): for stride=1 the temporal zero-pad could be folded into the kernel
        #             (masked first/last tiles) to remove this extra HBM round-trip entirely.
        xp = jnp.pad(x, ((0, 0), (0, cin_p - Cin), (pad, pad + T_pp - T_p), (0, 0)))
        xr = xp.reshape(N, cin_p, T_res, s, V).transpose(0, 3, 1, 2, 4)
        xr = xr.reshape(N, Cg, T_res * V)
        xr = jnp.pad(xr, ((0, 0), (0, 0), (0, Lp - T_res * V))).astype(cdt)

        # Fold BN (inference) scale into the conv weights; build the fused (Cout, K*Cin) slab.
        scale = self.bn_gamma / jnp.sqrt(self.bn_var + self.bn_eps)                # (Cout,)
        w = jnp.transpose(self.conv_w[..., 0], (0, 2, 1)) * scale[:, None, None]   # (Cout,K,Cin)
        w_f = jnp.zeros((cout_p, K, cin_p), jnp.float32).at[:Cout, :, :Cin].set(w)
        w_f = w_f.reshape(cout_p, K * cin_p).astype(cdt)
        shift_v = (self.conv_b - self.bn_mean) * scale + self.bn_beta
        shift = jnp.zeros((cout_p, 1), jnp.float32).at[:Cout, 0].set(shift_v)

        kernel = functools.partial(_tcn_kernel, K=K, stride=s, cin_p=cin_p, v=V,
                                   tm=tm, halo_pad=halo_pad)

        # Per-step VMEM estimate (double-buffered in/out blocks + resident weights + scratch).
        isz = jnp.dtype(cdt).itemsize
        vmem_est = (2 * Cg * (tm + halo_pad) * isz      # double-buffered main + halo x blocks
                    + 2 * cout_p * tm * 4               # double-buffered f32 output block
                    + cout_p * K * cin_p * isz          # resident fused weights
                    + cout_p * 128 * 4                  # resident shift (lane-padded)
                    + Cg * (tm + halo_pad) * isz        # comb scratch
                    + K * cin_p * tm * isz              # gather scratch
                    + (2 << 20))                        # slack
        cap = _vmem_capacity_bytes()
        # Floor 32 MiB (covers v5e's 16 MiB default scoped limit), cap at 0.9x physical VMEM
        # (never exceeds v7x's 64 MiB per-TC capacity).
        vmem_limit = int(min(cap * 9 // 10, max(vmem_est * 3 // 2, 32 << 20)))

        tm_over = tm // halo_pad            # tm is a multiple of halo_pad by construction

        out = pl.pallas_call(
            kernel,
            out_shape=jax.ShapeDtypeStruct((N, cout_p, Mo), jnp.float32),
            grid_spec=pltpu.PrefetchScalarGridSpec(
                num_scalar_prefetch=0,
                grid=(N, n_tiles),
                in_specs=[
                    # main lane tile
                    pl.BlockSpec((1, Cg, tm), lambda n, j: (n, 0, j)),
                    # halo lanes immediately past this tile's end (same array, small blocks)
                    pl.BlockSpec((1, Cg, halo_pad), lambda n, j: (n, 0, (j + 1) * tm_over)),
                    # resident fused weights and shift
                    pl.BlockSpec((cout_p, K * cin_p), lambda n, j: (0, 0)),
                    pl.BlockSpec((cout_p, 1), lambda n, j: (0, 0)),
                ],
                out_specs=pl.BlockSpec((1, cout_p, tm), lambda n, j: (n, 0, j)),
                scratch_shapes=[
                    pltpu.VMEM((Cg, tm + halo_pad), cdt),      # stitched main+halo window
                    pltpu.VMEM((K * cin_p, tm), cdt),          # gathered taps for fused matmul
                ],
            ),
            compiler_params=pltpu.CompilerParams(
                dimension_semantics=("parallel", "parallel"),  # batch x M tiles (megacore)
                vmem_limit_bytes=vmem_limit,
            ),
        )(xr, xr, w_f, shift)

        # (N, Cout_p, Mo) -> NCHW via a free slice + reshape (lane-dense, no transpose pass).
        return out[:, :Cout, :M_out].reshape(N, Cout, T_out, V)

    # pure-JAX reference (f32) for validation
    def reference(self, x):
        y = lax.conv_general_dilated(
            x, self.conv_w,
            window_strides=(self.stride, 1),
            padding=[(self.pad, self.pad), (0, 0)],
            dimension_numbers=("NCHW", "OIHW", "NCHW"),
        ) + self.conv_b[None, :, None, None]
        scale = self.bn_gamma / jnp.sqrt(self.bn_var + self.bn_eps)
        y = (y - self.bn_mean[None, :, None, None]) * scale[None, :, None, None] \
            + self.bn_beta[None, :, None, None]
        return y


# --------------------------------- main ----------------------------------- #
if __name__ == "__main__":
    key = jax.random.PRNGKey(0)
    k_x1, k_w1, k_x2, k_w2 = jax.random.split(key, 4)

    # Config 1: module defaults (kernel_size=9, stride=1).
    N, Cin, T, V, Cout = 2, 4, 16, 16, 8
    x1 = jax.random.normal(k_x1, (N, Cin, T, V), dtype=jnp.float32)
    mod1 = UnitTCN(Cin, Cout, kernel_size=9, stride=1, key=k_w1)
    y1 = jax.block_until_ready(mod1(x1))
    y1_ref = jax.block_until_ready(mod1.reference(x1))
    assert y1.shape == (N, Cout, T, V), y1.shape
    # bf16 activations/weights with f32 accumulation -> loosened tolerance vs f32 reference.
    assert jnp.allclose(y1, y1_ref, atol=5e-2, rtol=5e-2), \
        float(jnp.max(jnp.abs(y1 - y1_ref)))

    # Config 2: strided variant (exercises the stride-residue planes).
    N2, Cin2, T2, V2, Cout2 = 2, 6, 20, 16, 16
    x2 = jax.random.normal(k_x2, (N2, Cin2, T2, V2), dtype=jnp.float32)
    mod2 = UnitTCN(Cin2, Cout2, kernel_size=9, stride=2, key=k_w2)
    y2 = jax.block_until_ready(mod2(x2))
    y2_ref = jax.block_until_ready(mod2.reference(x2))
    assert y2.shape == y2_ref.shape, (y2.shape, y2_ref.shape)
    assert jnp.allclose(y2, y2_ref, atol=5e-2, rtol=5e-2), \
        float(jnp.max(jnp.abs(y2 - y2_ref)))

    print("KERNEL_OK")
</pallas_src>

<mosaic_0001>
module attributes {stable_mosaic.version = 11 : i64} {
  func.func @_tcn_kernel(%arg0: i32, %arg1: i32, %arg2: memref<1x16x256xbf16, #tpu.memory_space<vmem>>, %arg3: memref<1x16x128xbf16, #tpu.memory_space<vmem>>, %arg4: memref<8x144xbf16, #tpu.memory_space<vmem>>, %arg5: memref<8x1xf32, #tpu.memory_space<vmem>>, %arg6: memref<1x8x256xf32, #tpu.memory_space<vmem>>, %arg7: memref<16x384xbf16, #tpu.memory_space<vmem>>, %arg8: memref<144x256xbf16, #tpu.memory_space<vmem>>) attributes {dimension_semantics = [#tpu.dimension_semantics<parallel>, #tpu.dimension_semantics<parallel>], iteration_bounds = array<i64: 2, 1>, scalar_prefetch = 0 : i64, scratch_operands = 2 : i64, tpu.core_type = #tpu.core_type<tc>, window_params = [{transform_indices = @transform_0, window_bounds = array<i64: 1, 16, 256>}, {transform_indices = @transform_1, window_bounds = array<i64: 1, 16, 128>}, {pipeline_mode = #tpu.pipeline_mode<synchronous>, transform_indices = @transform_2, window_bounds = array<i64: 8, 144>}, {pipeline_mode = #tpu.pipeline_mode<synchronous>, transform_indices = @transform_3, window_bounds = array<i64: 8, 1>}, {transform_indices = @transform_4, window_bounds = array<i64: 1, 8, 256>}]} {
    %c0 = arith.constant 0 : index
    %c0_0 = arith.constant 0 : index
    %c0_1 = arith.constant 0 : index
    %0 = vector.load %arg2[%c0, %c0_0, %c0_1] : memref<1x16x256xbf16, #tpu.memory_space<vmem>>, vector<1x16x256xbf16>
    %1 = vector.shape_cast %0 : vector<1x16x256xbf16> to vector<16x256xbf16>
    %c0_2 = arith.constant 0 : index
    %c0_3 = arith.constant 0 : index
    %2 = vector.load %arg7[%c0_2, %c0_3] : memref<16x384xbf16, #tpu.memory_space<vmem>>, vector<16x256xbf16>
    tpu.vector_store %arg7[%c0_2, %c0_3], %1 {strides = array<i32>} : memref<16x384xbf16, #tpu.memory_space<vmem>>, vector<16x256xbf16>,
    %c0_4 = arith.constant 0 : index
    %c0_5 = arith.constant 0 : index
    %c0_6 = arith.constant 0 : index
    %3 = vector.load %arg3[%c0_4, %c0_5, %c0_6] : memref<1x16x128xbf16, #tpu.memory_space<vmem>>, vector<1x16x128xbf16>
    %4 = vector.shape_cast %3 : vector<1x16x128xbf16> to vector<16x128xbf16>
    %c0_7 = arith.constant 0 : index
    %c256 = arith.constant 256 : index
    %5 = vector.load %arg7[%c0_7, %c256] : memref<16x384xbf16, #tpu.memory_space<vmem>>, vector<16x128xbf16>
    tpu.vector_store %arg7[%c0_7, %c256], %4 {strides = array<i32>} : memref<16x384xbf16, #tpu.memory_space<vmem>>, vector<16x128xbf16>,
    %c0_8 = arith.constant 0 : index
    %c0_9 = arith.constant 0 : index
    %6 = vector.load %arg7[%c0_8, %c0_9] : memref<16x384xbf16, #tpu.memory_space<vmem>>, vector<16x256xbf16>
    %c0_10 = arith.constant 0 : index
    %c0_11 = arith.constant 0 : index
    %7 = vector.load %arg8[%c0_10, %c0_11] : memref<144x256xbf16, #tpu.memory_space<vmem>>, vector<16x256xbf16>
    tpu.vector_store %arg8[%c0_10, %c0_11], %6 {strides = array<i32>} : memref<144x256xbf16, #tpu.memory_space<vmem>>, vector<16x256xbf16>,
    %c0_12 = arith.constant 0 : index
    %c16 = arith.constant 16 : index
    %8 = vector.load %arg7[%c0_12, %c16] : memref<16x384xbf16, #tpu.memory_space<vmem>>, vector<16x256xbf16>
    %c16_13 = arith.constant 16 : index
    %c0_14 = arith.constant 0 : index
    %9 = vector.load %arg8[%c16_13, %c0_14] : memref<144x256xbf16, #tpu.memory_space<vmem>>, vector<16x256xbf16>
    tpu.vector_store %arg8[%c16_13, %c0_14], %8 {strides = array<i32>} : memref<144x256xbf16, #tpu.memory_space<vmem>>, vector<16x256xbf16>,
    %c0_15 = arith.constant 0 : index
    %c32 = arith.constant 32 : index
    %10 = vector.load %arg7[%c0_15, %c32] : memref<16x384xbf16, #tpu.memory_space<vmem>>, vector<16x256xbf16>
    %c32_16 = arith.constant 32 : index
    %c0_17 = arith.constant 0 : index
    %11 = vector.load %arg8[%c32_16, %c0_17] : memref<144x256xbf16, #tpu.memory_space<vmem>>, vector<16x256xbf16>
    tpu.vector_store %arg8[%c32_16, %c0_17], %10 {strides = array<i32>} : memref<144x256xbf16, #tpu.memory_space<vmem>>, vector<16x256xbf16>,
    %c0_18 = arith.constant 0 : index
    %c48 = arith.constant 48 : index
    %12 = vector.load %arg7[%c0_18, %c48] : memref<16x384xbf16, #tpu.memory_space<vmem>>, vector<16x256xbf16>
    %c48_19 = arith.constant 48 : index
    %c0_20 = arith.constant 0 : index
    %13 = vector.load %arg8[%c48_19, %c0_20] : memref<144x256xbf16, #tpu.memory_space<vmem>>, vector<16x256xbf16>
    tpu.vector_store %arg8[%c48_19, %c0_20], %12 {strides = array<i32>} : memref<144x256xbf16, #tpu.memory_space<vmem>>, vector<16x256xbf16>,
    %c0_21 = arith.constant 0 : index
    %c64 = arith.constant 64 : index
    %14 = vector.load %arg7[%c0_21, %c64] : memref<16x384xbf16, #tpu.memory_space<vmem>>, vector<16x256xbf16>
    %c64_22 = arith.constant 64 : index
    %c0_23 = arith.constant 0 : index
    %15 = vector.load %arg8[%c64_22, %c0_23] : memref<144x256xbf16, #tpu.memory_space<vmem>>, vector<16x256xbf16>
    tpu.vector_store %arg8[%c64_22, %c0_23], %14 {strides = array<i32>} : memref<144x256xbf16, #tpu.memory_space<vmem>>, vector<16x256xbf16>,
    %c0_24 = arith.constant 0 : index
    %c80 = arith.constant 80 : index
    %16 = vector.load %arg7[%c0_24, %c80] : memref<16x384xbf16, #tpu.memory_space<vmem>>, vector<16x256xbf16>
    %c80_25 = arith.constant 80 : index
    %c0_26 = arith.constant 0 : index
    %17 = vector.load %arg8[%c80_25, %c0_26] : memref<144x256xbf16, #tpu.memory_space<vmem>>, vector<16x256xbf16>
    tpu.vector_store %arg8[%c80_25, %c0_26], %16 {strides = array<i32>} : memref<144x256xbf16, #tpu.memory_space<vmem>>, vector<16x256xbf16>,
    %c0_27 = arith.constant 0 : index
    %c96 = arith.constant 96 : index
    %18 = vector.load %arg7[%c0_27, %c96] : memref<16x384xbf16, #tpu.memory_space<vmem>>, vector<16x256xbf16>
    %c96_28 = arith.constant 96 : index
    %c0_29 = arith.constant 0 : index
    %19 = vector.load %arg8[%c96_28, %c0_29] : memref<144x256xbf16, #tpu.memory_space<vmem>>, vector<16x256xbf16>
    tpu.vector_store %arg8[%c96_28, %c0_29], %18 {strides = array<i32>} : memref<144x256xbf16, #tpu.memory_space<vmem>>, vector<16x256xbf16>,
    %c0_30 = arith.constant 0 : index
    %c112 = arith.constant 112 : index
    %20 = vector.load %arg7[%c0_30, %c112] : memref<16x384xbf16, #tpu.memory_space<vmem>>, vector<16x256xbf16>
    %c112_31 = arith.constant 112 : index
    %c0_32 = arith.constant 0 : index
    %21 = vector.load %arg8[%c112_31, %c0_32] : memref<144x256xbf16, #tpu.memory_space<vmem>>, vector<16x256xbf16>
    tpu.vector_store %arg8[%c112_31, %c0_32], %20 {strides = array<i32>} : memref<144x256xbf16, #tpu.memory_space<vmem>>, vector<16x256xbf16>,
    %c0_33 = arith.constant 0 : index
    %c128 = arith.constant 128 : index
    %22 = vector.load %arg7[%c0_33, %c128] : memref<16x384xbf16, #tpu.memory_space<vmem>>, vector<16x256xbf16>
    %c128_34 = arith.constant 128 : index
    %c0_35 = arith.constant 0 : index
    %23 = vector.load %arg8[%c128_34, %c0_35] : memref<144x256xbf16, #tpu.memory_space<vmem>>, vector<16x256xbf16>
    tpu.vector_store %arg8[%c128_34, %c0_35], %22 {strides = array<i32>} : memref<144x256xbf16, #tpu.memory_space<vmem>>, vector<16x256xbf16>,
    %c0_36 = arith.constant 0 : index
    %c0_37 = arith.constant 0 : index
    %24 = vector.load %arg4[%c0_36, %c0_37] : memref<8x144xbf16, #tpu.memory_space<vmem>>, vector<8x144xbf16>
    %c0_38 = arith.constant 0 : index
    %c0_39 = arith.constant 0 : index
    %25 = vector.load %arg8[%c0_38, %c0_39] : memref<144x256xbf16, #tpu.memory_space<vmem>>, vector<144x256xbf16>
    %cst = arith.constant dense<0.000000e+00> : vector<8x256xf32>
    %26 = tpu.matmul %24, %25, %cst {dimension_numbers = #tpu.dot_dimension_numbers<[1], [0], [0], [1], [0, 0, 1, 1], [], []>} : vector<8x144xbf16>, vector<144x256xbf16>, vector<8x256xf32> -> vector<8x256xf32>
    %c0_40 = arith.constant 0 : index
    %c0_41 = arith.constant 0 : index
    %27 = vector.load %arg5[%c0_40, %c0_41] : memref<8x1xf32, #tpu.memory_space<vmem>>, vector<8x1xf32>
    %28 = vector.broadcast %27 : vector<8x1xf32> to vector<8x256xf32>
    %29 = arith.addf %26, %28 : vector<8x256xf32>
    %c0_42 = arith.constant 0 : index
    %c0_43 = arith.constant 0 : index
    %c0_44 = arith.constant 0 : index
    %30 = vector.load %arg6[%c0_42, %c0_43, %c0_44] : memref<1x8x256xf32, #tpu.memory_space<vmem>>, vector<1x8x256xf32>
    %31 = vector.shape_cast %30 : vector<1x8x256xf32> to vector<8x256xf32>
    %32 = vector.shape_cast %29 : vector<8x256xf32> to vector<1x8x256xf32>
    tpu.vector_store %arg6[%c0_42, %c0_43, %c0_44], %32 {strides = array<i32>} : memref<1x8x256xf32, #tpu.memory_space<vmem>>, vector<1x8x256xf32>,
    return
  }
  func.func @transform_0(%arg0: i32, %arg1: i32) -> (i32, i32, i32) {
    %c0_i32 = arith.constant 0 : i32
    %c0_i32_0 = arith.constant 0 : i32
    return %arg0, %c0_i32, %arg1 : i32, i32, i32
  }
  func.func @transform_1(%arg0: i32, %arg1: i32) -> (i32, i32, i32) {
    %c1_i32 = arith.constant 1 : i32
    %0 = arith.addi %arg1, %c1_i32 : i32
    %c2_i32 = arith.constant 2 : i32
    %1 = arith.muli %0, %c2_i32 : i32
    %c0_i32 = arith.constant 0 : i32
    %c0_i32_0 = arith.constant 0 : i32
    return %arg0, %c0_i32, %1 : i32, i32, i32
  }
  func.func @transform_2(%arg0: i32, %arg1: i32) -> (i32, i32) {
    %c0_i32 = arith.constant 0 : i32
    %c0_i32_0 = arith.constant 0 : i32
    %c0_i32_1 = arith.constant 0 : i32
    return %c0_i32, %c0_i32_0 : i32, i32
  }
  func.func @transform_3(%arg0: i32, %arg1: i32) -> (i32, i32) {
    %c0_i32 = arith.constant 0 : i32
    %c0_i32_0 = arith.constant 0 : i32
    %c0_i32_1 = arith.constant 0 : i32
    return %c0_i32, %c0_i32_0 : i32, i32
  }
  func.func @transform_4(%arg0: i32, %arg1: i32) -> (i32, i32, i32) {
    %c0_i32 = arith.constant 0 : i32
    %c0_i32_0 = arith.constant 0 : i32
    return %arg0, %c0_i32, %arg1 : i32, i32, i32
  }
}

</mosaic_0001>

<bundles_post_ra>
// kernel: tpu_custom_call.1
= control target key start
LH: loop header
LB: loop body
LE: loop exit
PB: predicated region body
PF: predicated region fallthrough
CT: control target
= control target key end

     0   :  { %s1367_s0 = inlined_call_operand.hbm [shape: bf16[2,16,384], index: 0, kind: input, shape index: {}]   ;;  %s1368_s1 = inlined_call_operand.hbm [shape: bf16[2,16,384], index: 1, kind: input, shape index: {}]   ;;  %s1369_s2 = inlined_call_operand.vmem [shape: bf16[8,144], index: 2, kind: input, shape index: {}]   ;;  %s1370_s3 = inlined_call_operand.vmem [shape: f32[8,1], index: 3, kind: input, shape index: {}]   ;;  %s1371_s4 = inlined_call_operand.hbm [shape: f32[2,8,256], index: 4, kind: output, shape index: {}]  }
   0x1   :  { %1374 = sst [smem:[#allocation16_spill]] %s1367_s0 }
   0x2   :  { %9 = vsyncpa [#allocation5], 0 }
   0x3   :  { %11 = vsyncpa [#allocation5 + $0x1], 0 }
   0x4   :  { %12 = vsyncpa [#allocation8], 0 }
   0x5   :  { %14 = vsyncpa [#allocation8 + $0x1], 0 }
   0x6   :  { %15 = vsyncpa [#allocation6], 0 }
   0x7   :  { %17 = vsyncpa [#allocation6 + $0x1], 0  ;;  %s1127_s15 = smov 0   ;;  %s1129_s16 = smov 0  }
   0x8   :  { %s1131_s17 = smov 0   ;;  %s1133_s18 = smov 0  }
   0x9   :  { %s1135_s19 = smov 0   ;;  %s1137_s20 = smov 0  }
   0xa LB: > { %1375 = sst [smem:[#allocation13_spill]] %s1072_s17  ;;  %s815_s21 = sadd.s32 4294967295, %s1084_s20   ;;  %s1084_s20 = sphi %s1137_s20, %s23_s20   ;;  %s1080_s19 = sphi %s1135_s19, %s1391_s19   ;;  %s1076_s18 = sphi %s1133_s18, %s1390_s18   ;;  %s1072_s17 = sphi %s1131_s17, %s1386_s17   ;;  %s1068_s16 = sphi %s1129_s16, %s1389_s16   ;;  %s1064_s15 = sphi %s1127_s15, %s1388_s15  }
   0xb   : > { %s816_s22 = sadd.s32 4294967294, %s1084_s20   ;;  %s35_s23 = sadd.s32 1, %s1080_s19 }
   0xc   : > { %s44_s24 = sadd.s32 1, %s1072_s17  ;;  %p37_p0 = scmp.ge.s32.totalorder %s35_s23, 2 }
   0xd   : > { %p51_p1 = scmp.ne.s32.totalorder %s1072_s17, %s1068_s16  ;;  %p52_p2 = scmp.eq.s32.totalorder %s1084_s20, 0 }
   0xe   : > { %p57_p3 = scmp.ne.s32.totalorder %s1068_s16, %s1064_s15  ;;  %s1393_s23 = smov (%p37_p0, %s35_s23), 0 }
   0xf   : > { %1376 = sst [smem:[#allocation14_spill]] %s1393_s23  ;;  %p1168_p4 = por %p52_p2, %p51_p1 }
  0x10   : > { %p58_p5 = scmp.eq.s32.totalorder %s815_s21, 0  ;;  %s39_s26 = ssub.s32 %s1080_s19, %s1393_s23 }
  0x11   : > { %p157_p6 = scmp.eq.s32.totalorder %s815_s21, 1  ;;  %p42_p7 = scmp.eq.s32.totalorder %s39_s26, 0 }
  0x12   : > { %p1174_p8 = por %p58_p5, %p57_p3  ;;  %p163_p10 = scmp.eq.s32.totalorder %s816_s22, 1 }
  0x13   : > { %p1178_p9 = por %p157_p6, %p51_p1  ;;  %p818_p12 = scmp.ge.s32.totalorder %s1084_s20, 2 }
  0x14   : > { %s1183_s29 = scalar_select %p42_p7, %s1072_s17, %s44_s24  }
  0x15   : > { %p1185_p11 = por %p163_p10, %p57_p3  ;;  %p872_p13 = scmp.lt.s32.totalorder %s1084_s20, 2 }
  0x16   : > { %1380 = sst [smem:[#allocation15_spill]] %s1183_s29  ;;  %s1192_s5 = sand.u32 1, %s1072_s17  }
  0x17   : > { %s819_s6 = sshll.u32 %s1192_s5, 4  ;;  %s854_s7 = smul.u32 384, %s1080_s19 }
  0x18   : > { %s193_s8 = scalar_lea.vmem [#allocation4], %s819_s6  ;;  %p1198_p0 = pnand %p872_p13, %p1168_p4 }
  0x19   : > { %s209_s9 = sshll.u32 %s193_s8, 4  ;;  %s1383_s0 = sld [smem:[#allocation16_spill]]  ;;  %s210_s9 = int_to_ptr.vmem [resolvable:$true] %s209_s9 }
  0x1a   : > { %s190_s14 = scalar_lea.sflag [#allocation5], %s1192_s5  ;;  %p945_p1 = pneg %p1198_p0 }
  0x1b   : > { %s956_s21 = scalar_lea.vmem %s210_s9, 256  ;;  %s1086_s22 = smov [#allocation4]  }
  0x1c   : > { %p957_p2 = scmp.ne.s32.totalorder %s210_s9, %s956_s21  ;;  %s961_s24 = sshll.u32 %s1086_s22, 4  ;;  %s962_s24 = int_to_ptr.vmem [resolvable:$false] %s961_s24 }
  0x1d   : > { %s963_s25 = scalar_lea.vmem %s962_s24, 512  ;;  %p964_p5 = scmp.lt.s32.totalorder %s210_s9, %s962_s24 }
  0x1e   : > { %p959_p3 = pnand %p957_p2, %p945_p1  ;;  %p965_p6 = scmp.lt.s32.totalorder %s963_s25, %s956_s21 }
  0x1f   : > { %s206_s13 = scalar_lea.hbm %s1383_s0, %s854_s7 }
  0x20   : > { %p960_p4 = pneg %p959_p3  ;;  %p966_p7 = por %p965_p6, %p964_p5 }
  0x22   : > { %p967_p10 = pnand %p966_p7, %p960_p4 }
  0x24   : > { %970 = shalt.err (!%p967_p10)
}
  0x25   : > { %s1087_s26 = smov 192   ;;  %s1088_s6 = smov 128  }
  0x26   : > { %s1089_s8 = smov 8   ;;  %p823_p13 = scmp.ge.s32.totalorder %s1084_s20, 1 }
  0x27   : > { %864 = dma.hbm_to_vmem [thread:$0]  (!%p1198_p0), %s206_s13, 256, %s210_s9, %s190_s14, %s1087_s26, %s1088_s6, %s1089_s8  }
  0x28   : > { %p241_p2 = scmp.lt.s32.totalorder %s1084_s20, 3  ;;  %s821_s11 = sshll.u32 %s1192_s5, 3 }
  0x29   : > { %s746_s24 = scalar_lea.hbm %s1368_s1, %s854_s7  ;;  %s223_s25 = scalar_lea.vmem [#allocation7], %s821_s11 }
  0x2a   : > { %p1219_p3 = pnand %p823_p13, %p241_p2  ;;  %s233_s0 = sshll.u32 %s223_s25, 4  ;;  %s234_s0 = int_to_ptr.vmem [resolvable:$true] %s233_s0 }
  0x2b   : > { %s747_s23 = scalar_lea.hbm %s746_s24, 128  ;;  %s220_s29 = scalar_lea.sflag [#allocation8], %s1192_s5 }
  0x2c   : > { %s984_s17 = scalar_lea.vmem %s234_s0, 128  ;;  %s1090_s9 = smov [#allocation7]  }
  0x2d   : > { %p985_p4 = scmp.ne.s32.totalorder %s234_s0, %s984_s17  ;;  %s989_s13 = sshll.u32 %s1090_s9, 4  ;;  %s990_s13 = int_to_ptr.vmem [resolvable:$false] %s989_s13 }
  0x2e   : > { %s991_s14 = scalar_lea.vmem %s990_s13, 256  ;;  %p992_p7 = scmp.lt.s32.totalorder %s234_s0, %s990_s13 }
  0x2f   : > { %p987_p5 = pnand %p985_p4, %p945_p1  ;;  %p993_p10 = scmp.lt.s32.totalorder %s991_s14, %s984_s17 }
  0x31   : > { %p988_p6 = pneg %p987_p5  ;;  %p994_p13 = por %p993_p10, %p992_p7 }
  0x33   : > { %p995_p2 = pnand %p994_p13, %p988_p6 }
  0x35   : > { %998 = shalt.err (!%p995_p2)
}
  0x36   : > { %s1091_s7 = smov 64   ;;  %s1092_s6 = smov 4  }
  0x37   : > { %867 = dma.hbm_to_vmem [thread:$0]  (!%p1198_p0), %s747_s23, 128, %s234_s0, %s220_s29, %s1087_s26, %s1091_s7, %s1092_s6  }
  0x38   : > { %245 = sbr.rel (%p1219_p3) target bundleno = 467 (0x1d3), region = 36  ;;  %s1238_s5 = sand.u32 (!%p1219_p3), 1, %s1068_s16  }
  0x39   : > { %s824_s17 = sshll.u32 (!%p1219_p3), %s1238_s5, 4  ;;  %s248_s8 = scalar_lea.sflag (!%p1219_p3), [#allocation5], %s1238_s5 }
  0x3a   : > { %s251_s11 = scalar_lea.vmem (!%p1219_p3), [#allocation4], %s824_s17 }
  0x3d   : > { %1051 = dma.done.wait (%p1174_p8), %s248_s8, 256  }
  0x3e   : > { %1053 = vsyncadd (%p1174_p8), %s248_s8, 4294967040  ;;  %s825_s0 = sshll.u32 %s1238_s5, 3  ;;  %s257_s23 = scalar_lea.sflag [#allocation8], %s1238_s5 }
  0x3f   : > { %s260_s29 = scalar_lea.vmem [#allocation7], %s825_s0 }
  0x40   : > { %1055 = dma.done.wait (%p1174_p8), %s257_s23, 128  }
  0x41   : > { %1057 = vsyncadd (%p1174_p8), %s257_s23, 4294967168  ;;  %v1254_v0 = vld [vmem:[%s251_s11 + $0x8] sm:$0xff]  ;;  %v1256_v1 = vld [vmem:[%s251_s11] sm:$0xff]  ;;  %s1093_s10 = smov 16   ;;  %s1094_s27 = smov 32   ;;  %vm507_vm0 = vcmask 130048  }
  0x42   : > { %v304_v2 = vld [vmem:[%s260_s29 + $0x4] sm:$0xf]  ;;  %302 = vst [vmem:[#allocation2 + $0xc] sm:$0xff] %v1254_v0  ;;  %498 = vrot.lane.b32.xlu1 %v1254_v0, %s1093_s10  ;;  %301 = vst [vmem:[#allocation2] sm:$0xff] %v1256_v1  ;;  %494 = vrot.lane.b32.xlu0 %v1256_v1, %s1093_s10  ;;  %v303_v3 = vld [vmem:[%s260_s29] sm:$0xf]  ;;  %v830_v17 = vcombine.high %v1256_v1, %v1254_v0  ;;  %v829_v18 = vcombine.low %v1256_v1, %v1254_v0 }
  0x43   : > { %306 = vst [vmem:[#allocation2 + $0x14] sm:$0xf] %v304_v2  ;;  %305 = vst [vmem:[#allocation2 + $0x8] sm:$0xf] %v303_v3  ;;  %s1095_s26 = smov 48   ;;  %s1096_s12 = smov 64  }
  0x44   : > { %s1097_s21 = smov 80   ;;  %s1098_s22 = smov 96   ;;  %v1281_v20 = vld [vmem:[%s1369_s2] sm:$0xff]  ;;  %v1100_v23 = vmov 0   ;;  %vm331_vm1 = vcmask 1043456   ;;  %vm478_vm2 = vcmask 261120  }
  0x45   : > { %s1099_s24 = smov 112   ;;  %v828_v21 = vcombine.high %v1281_v20, %v1281_v20  ;;  %v538_v22 = vld [vmem:[%s1370_s3] sm:$0xff]  ;;  %935 = vset.pattern.permute.xlu0 %v1100_v23  ;;  %vm449_vm3 = vcmask 392192   ;;  %vm420_vm4 = vcmask 523264   ;;  %vm391_vm5 = vcmask 654336   ;;  %s853_s7 = sshll.u32 %s1076_s18, 8 }
  0x46   : > { %vm362_vm6 = vcmask 785408   ;;  %vm333_vm7 = vcmask 916480   ;;  %s289_s6 = scalar_lea.vmem [#allocation9], %s824_s17  ;;  %s1319_s23 = scalar_lea.hbm %s1371_s4, %s853_s7 }
  0x47   : > { %847 = vmatprep.mubr.msk.bf16.mxu0 %vm507_vm0, %v828_v21  ;;  %s704_s8 = sshll.u32 %s289_s6, 4  ;;  %s688_s18 = scalar_lea.sflag [#allocation6], %s1238_s5  ;;  %s1321_s8 = int_to_ptr.vmem [resolvable:$true] %s704_s8 }
  0x48   : > { %s1000_s17 = scalar_lea.vmem %s1321_s8, 256  ;;  %s1101_s29 = smov [#allocation9]  }
  0x49   : > { %p1001_p8 = scmp.ne.s32.totalorder %s1321_s8, %s1000_s17 }
  0x4a   : > { %v489_v4 = vld [vmem:[#allocation2 + $0x14] sm:$0xf]  ;;  %v487_v5 = vld [vmem:[#allocation2 + $0x8] sm:$0xf] }
  0x4b   : > { %500 = vrot.lane.b32.xlu1 %v489_v4, %s1093_s10  ;;  %496 = vrot.lane.b32.xlu0 %v487_v5, %s1093_s10  ;;  %v458_v6 = vld [vmem:[#allocation2 + $0x8] sm:$0xf]  ;;  %v460_v7 = vld [vmem:[#allocation2 + $0x14] sm:$0xf]  ;;  %p1002_p0 = pnand %p1001_p8, %p1178_p9  ;;  %s1004_s10 = sshll.u32 %s1101_s29, 4  ;;  %s1005_s10 = int_to_ptr.vmem [resolvable:$false] %s1004_s10 }
  0x4c   : > { %v429_v8 = vld [vmem:[#allocation2 + $0x8] sm:$0xf]  ;;  %v431_v9 = vld [vmem:[#allocation2 + $0x14] sm:$0xf]  ;;  %p1007_p3 = scmp.lt.s32.totalorder %s1321_s8, %s1005_s10 }
  0x4d   : > { %v400_v10 = vld [vmem:[#allocation2 + $0x8] sm:$0xf]  ;;  %v402_v11 = vld [vmem:[#allocation2 + $0x14] sm:$0xf]  ;;  %p1003_p1 = pneg %p1002_p0 }
  0x4e   : > { %v371_v12 = vld [vmem:[#allocation2 + $0x8] sm:$0xf]  ;;  %v373_v13 = vld [vmem:[#allocation2 + $0x14] sm:$0xf] }
  0x4f   : > { %467 = vrot.lane.b32.xlu1 %v458_v6, %s1094_s27  ;;  %465 = vrot.lane.b32.xlu0 %v1256_v1, %s1094_s27  ;;  %v342_v14 = vld [vmem:[#allocation2 + $0x8] sm:$0xf]  ;;  %v344_v15 = vld [vmem:[#allocation2 + $0x14] sm:$0xf] }
  0x50   : > { %v312_v16 = vld [vmem:[#allocation2 + $0x8] sm:$0xf]  ;;  %v314_v19 = vld [vmem:[#allocation2 + $0x14] sm:$0xf] }
  0x53   : > { %471 = vrot.lane.b32.xlu1 %v460_v7, %s1094_s27  ;;  %469 = vrot.lane.b32.xlu0 %v1254_v0, %s1094_s27  ;;  %s1006_s27 = scalar_lea.vmem %s1005_s10, 512 }
  0x54   : > { %p1008_p4 = scmp.lt.s32.totalorder %s1006_s27, %s1000_s17 }
  0x56   : > { %p1009_p5 = por %p1008_p4, %p1007_p3 }
  0x57   : > { %438 = vrot.lane.b32.xlu1 %v429_v8, %s1095_s26  ;;  %436 = vrot.lane.b32.xlu0 %v1256_v1, %s1095_s26 }
  0x58   : > { %p1010_p6 = pnand %p1009_p5, %p1003_p1 }
  0x5b   : > { %442 = vrot.lane.b32.xlu1 %v431_v9, %s1095_s26  ;;  %440 = vrot.lane.b32.xlu0 %v1254_v0, %s1095_s26 }
  0x5f   : > { %409 = vrot.lane.b32.xlu1 %v400_v10, %s1096_s12  ;;  %407 = vrot.lane.b32.xlu0 %v1256_v1, %s1096_s12 }
  0x63   : > { %413 = vrot.lane.b32.xlu1 %v402_v11, %s1096_s12  ;;  %411 = vrot.lane.b32.xlu0 %v1254_v0, %s1096_s12 }
  0x67   : > { %380 = vrot.lane.b32.xlu1 %v371_v12, %s1097_s21  ;;  %378 = vrot.lane.b32.xlu0 %v1256_v1, %s1097_s21 }
  0x6b   : > { %384 = vrot.lane.b32.xlu1 %v373_v13, %s1097_s21  ;;  %382 = vrot.lane.b32.xlu0 %v1254_v0, %s1097_s21 }
  0x6f   : > { %351 = vrot.lane.b32.xlu1 %v342_v14, %s1098_s22  ;;  %349 = vrot.lane.b32.xlu0 %v1256_v1, %s1098_s22 }
  0x73   : > { %355 = vrot.lane.b32.xlu1 %v344_v15, %s1098_s22  ;;  %353 = vrot.lane.b32.xlu0 %v1254_v0, %s1098_s22 }
  0x77   : > { %321 = vrot.lane.b32.xlu1 %v312_v16, %s1099_s24  ;;  %319 = vrot.lane.b32.xlu0 %v1256_v1, %s1099_s24 }
  0x7b   : > { %325 = vrot.lane.b32.xlu1 %v314_v19, %s1099_s24  ;;  %323 = vrot.lane.b32.xlu0 %v1254_v0, %s1099_s24 }
  0x7f   : > { %541 = vperm.xlu0 %935, %v538_v22  }
  0xb4   : > { %v499_v24 = vpop.permute.xlu1 %498  ;;  %v495_v25 = vpop.permute.xlu0 %494 }
  0xb5   : > { %v504_v27 = vrot.slane %v499_v24, 4  ;;  %v502_v30 = vrot.slane %v495_v25, 4 }
  0xbd   : > { %v501_v26 = vpop.permute.xlu1 %500  ;;  %v497_v29 = vpop.permute.xlu0 %496 }
  0xbe   : > { %v505_v28 = vrot.slane %v501_v26, 4  ;;  %v503_v31 = vrot.slane %v497_v29, 4 }
  0xc0   : > { %v509_v32 = vsel %vm331_vm1, %v504_v27, %v505_v28  ;;  %v506_v34 = vsel %vm331_vm1, %v502_v30, %v503_v31 }
  0xc1   : > { %v468_v33 = vpop.permute.xlu1 %467  ;;  %v510_v35 = vsel %vm507_vm0, %v499_v24, %v509_v32  ;;  %v466_v36 = vpop.permute.xlu0 %465  ;;  %v508_v37 = vsel %vm507_vm0, %v495_v25, %v506_v34 }
  0xc2   : > { %v474_v38 = vrot.slane %v468_v33, 4  ;;  %v473_v39 = vrot.slane %v466_v36, 4  ;;  %v844_v40 = vcombine.high %v508_v37, %v510_v35  ;;  %v843_v41 = vcombine.low %v508_v37, %v510_v35 }
  0xc4   : > { %644 = vmatprep.subr.bf16.mxu0 %v844_v40  ;;  %v477_v45 = vsel %vm331_vm1, %v473_v39, %v474_v38 }
  0xc5   : > { %v472_v42 = vpop.permute.xlu1 %471  ;;  %645 = vmatpush1.bf16.msra.mxu0 %v843_v41  ;;  %v470_v44 = vpop.permute.xlu0 %469  ;;  %v479_v49 = vsel %vm478_vm2, %v466_v36, %v477_v45 }
  0xc6   : > { %v476_v43 = vrot.slane %v472_v42, 4  ;;  %v475_v46 = vrot.slane %v470_v44, 4 }
  0xc8   : > { %v480_v47 = vsel %vm331_vm1, %v475_v46, %v476_v43 }
  0xc9   : > { %v439_v48 = vpop.permute.xlu1 %438  ;;  %v481_v50 = vsel %vm478_vm2, %v470_v44, %v480_v47  ;;  %v437_v51 = vpop.permute.xlu0 %436 }
  0xca   : > { %v841_v52 = vcombine.low %v479_v49, %v481_v50  ;;  %v842_v53 = vcombine.high %v479_v49, %v481_v50  ;;  %v445_v54 = vrot.slane %v439_v48, 4  ;;  %v444_v55 = vrot.slane %v437_v51, 4 }
  0xcc   : > { %646 = vmatprep.subr.bf16.mxu0 %v842_v53  ;;  %v448_v59 = vsel %vm331_vm1, %v444_v55, %v445_v54 }
  0xcd   : > { %v443_v56 = vpop.permute.xlu1 %442  ;;  %647 = vmatpush1.bf16.msra.mxu0 %v841_v52  ;;  %v441_v58 = vpop.permute.xlu0 %440  ;;  %v450_v63 = vsel %vm449_vm3, %v437_v51, %v448_v59 }
  0xce   : > { %v447_v57 = vrot.slane %v443_v56, 4  ;;  %v446_v60 = vrot.slane %v441_v58, 4 }
  0xd0   : > { %v451_v61 = vsel %vm331_vm1, %v446_v60, %v447_v57 }
  0xd1   : > { %v410_v62 = vpop.permute.xlu1 %409  ;;  %v452_v2 = vsel %vm449_vm3, %v441_v58, %v451_v61  ;;  %v408_v3 = vpop.permute.xlu0 %407 }
  0xd2   : > { %v839_v4 = vcombine.low %v450_v63, %v452_v2  ;;  %v840_v5 = vcombine.high %v450_v63, %v452_v2  ;;  %v416_v6 = vrot.slane %v410_v62, 4  ;;  %v415_v7 = vrot.slane %v408_v3, 4  ;;  %v938_v63 = vld [vmem:[#allocation2 + $0x8] ss:$12 sps:$4 sm:$0xff]   ;;  %v940_v2 = vld [vmem:[#allocation2 + $0x4] ss:$12 sps:$4 sm:$0xff]  }
  0xd4   : > { %648 = vmatprep.subr.bf16.mxu0 %v840_v5  ;;  %v419_v11 = vsel %vm331_vm1, %v415_v7, %v416_v6 }
  0xd5   : > { %v414_v8 = vpop.permute.xlu1 %413  ;;  %649 = vmatpush1.bf16.msra.mxu0 %v839_v4  ;;  %v412_v10 = vpop.permute.xlu0 %411  ;;  %v421_v15 = vsel %vm420_vm4, %v408_v3, %v419_v11  ;;  %v827_v3 = vcombine.low %v1281_v20, %v1281_v20 }
  0xd6   : > { %v418_v9 = vrot.slane %v414_v8, 4  ;;  %v417_v12 = vrot.slane %v412_v10, 4 }
  0xd8   : > { %v422_v13 = vsel %vm331_vm1, %v417_v12, %v418_v9 }
  0xd9   : > { %v381_v14 = vpop.permute.xlu1 %380  ;;  %v423_v16 = vsel %vm420_vm4, %v412_v10, %v422_v13  ;;  %v379_v19 = vpop.permute.xlu0 %378 }
  0xda   : > { %v837_v21 = vcombine.low %v421_v15, %v423_v16  ;;  %v838_v22 = vcombine.high %v421_v15, %v423_v16  ;;  %v387_v23 = vrot.slane %v381_v14, 4  ;;  %v386_v24 = vrot.slane %v379_v19, 4 }
  0xdc   : > { %650 = vmatprep.subr.bf16.mxu0 %v838_v22  ;;  %v390_v28 = vsel %vm331_vm1, %v386_v24, %v387_v23 }
  0xdd   : > { %v385_v25 = vpop.permute.xlu1 %384  ;;  %651 = vmatpush1.bf16.msra.mxu0 %v837_v21  ;;  %v383_v27 = vpop.permute.xlu0 %382  ;;  %v392_v32 = vsel %vm391_vm5, %v379_v19, %v390_v28 }
  0xde   : > { %v389_v26 = vrot.slane %v385_v25, 4  ;;  %v388_v29 = vrot.slane %v383_v27, 4 }
  0xe0   : > { %v393_v30 = vsel %vm331_vm1, %v388_v29, %v389_v26 }
  0xe1   : > { %v352_v31 = vpop.permute.xlu1 %351  ;;  %v394_v33 = vsel %vm391_vm5, %v383_v27, %v393_v30  ;;  %v350_v34 = vpop.permute.xlu0 %349 }
  0xe2   : > { %v835_v35 = vcombine.low %v392_v32, %v394_v33  ;;  %v836_v36 = vcombine.high %v392_v32, %v394_v33  ;;  %v358_v37 = vrot.slane %v352_v31, 4  ;;  %v357_v38 = vrot.slane %v350_v34, 4 }
  0xe4   : > { %652 = vmatprep.subr.bf16.mxu0 %v836_v36  ;;  %v361_v42 = vsel %vm331_vm1, %v357_v38, %v358_v37 }
  0xe5   : > { %v356_v39 = vpop.permute.xlu1 %355  ;;  %653 = vmatpush1.bf16.msra.mxu0 %v835_v35  ;;  %v354_v41 = vpop.permute.xlu0 %353  ;;  %v363_v46 = vsel %vm362_vm6, %v350_v34, %v361_v42 }
  0xe6   : > { %v360_v40 = vrot.slane %v356_v39, 4  ;;  %v359_v43 = vrot.slane %v354_v41, 4 }
  0xe8   : > { %v364_v44 = vsel %vm331_vm1, %v359_v43, %v360_v40 }
  0xe9   : > { %v322_v45 = vpop.permute.xlu1 %321  ;;  %v365_v47 = vsel %vm362_vm6, %v354_v41, %v364_v44  ;;  %v320_v48 = vpop.permute.xlu0 %319 }
  0xea   : > { %v833_v49 = vcombine.low %v363_v46, %v365_v47  ;;  %v834_v50 = vcombine.high %v363_v46, %v365_v47  ;;  %v328_v51 = vrot.slane %v322_v45, 4  ;;  %v327_v52 = vrot.slane %v320_v48, 4 }
  0xec   : > { %654 = vmatprep.subr.bf16.mxu0 %v834_v50  ;;  %v332_v56 = vsel %vm331_vm1, %v327_v52, %v328_v51 }
  0xed   : > { %v326_v53 = vpop.permute.xlu1 %325  ;;  %655 = vmatpush1.bf16.msra.mxu0 %v833_v49  ;;  %v324_v55 = vpop.permute.xlu0 %323  ;;  %v334_v59 = vsel %vm333_vm7, %v320_v48, %v332_v56 }
  0xee   : > { %v330_v54 = vrot.slane %v326_v53, 4  ;;  %v329_v57 = vrot.slane %v324_v55, 4 }
  0xf0   : > { %v335_v58 = vsel %vm331_vm1, %v329_v57, %v330_v54 }
  0xf1   : > { %v336_v60 = vsel %vm333_vm7, %v324_v55, %v335_v58 }
  0xf2   : > { %v831_v61 = vcombine.low %v334_v59, %v336_v60  ;;  %v832_v62 = vcombine.high %v334_v59, %v336_v60 }
  0xf4   : > { %656 = vmatprep.subr.bf16.mxu0 %v832_v62 }
  0xf5   : > { %657 = vmatpush1.bf16.msra.mxu0 %v831_v61 }
  0xf6   : > { %658 = vmatprep.subr.bf16.mxu0 %v830_v17 }
  0xf9   : > { %659 = vmatpush1.bf16.msra.mxu0 %v829_v18 }
  0xfa   : > { %674 = vmatprep.subr.bf16.mxu0 %v938_v63  ;;  %v542_v4 = vpop.permute.xlu0 %541 }
  0xfd   : > { %675 = vmatpush2.bf16.msra.mxu0 %v940_v2 }
 0x100   : > { %677 = vmatmul.mubr.bf16.vlgmr.msra.gmra.mxu0 %v827_v3 }
 0x1c0   : > { %v678_v5 = vpop.f32.mrf.mxu0 }
 0x1c1   : > { %v679_v17 = vadd.f32 %v678_v5, %v542_v4 }
 0x1c2   : > { %v680_v6 = vpop.f32.mrf.mxu0 }
 0x1c3   : > { %685 = vst [vmem:[%s289_s6] sm:$0xff] %v679_v17  ;;  %v681_v0 = vadd.f32 %v680_v6, %v542_v4 }
 0x1c4   : > { %v682_v1 = vpop.f32.mrf.mxu0 }
 0x1c5   : > { %686 = vst [vmem:[%s289_s6 + $0x8] sm:$0xff] %v681_v0 }
 0x1c6   : > { %v683_v18 = vpop.f32.mrf.mxu0 }
 0x1c7   : > { %1013 = shalt.err (!%p1010_p6)
}
 0x1c8   : > { %s1014_s26 = scalar_lea.hbm %s1319_s23, 256  ;;  %s1018_s21 = scalar_lea.hbm %s1371_s4, 512 }
 0x1c9   : > { %p1015_p7 = scmp.ne.s32.totalorder %s1319_s23, %s1014_s26  ;;  %p1019_p2 = scmp.lt.s32.totalorder %s1319_s23, %s1371_s4 }
 0x1ca   : > { %p1020_p8 = scmp.lt.s32.totalorder %s1018_s21, %s1014_s26 }
 0x1cb   : > { %p1016_p10 = pnand %p1015_p7, %p1178_p9 }
 0x1cc   : > { %p1021_p0 = por %p1020_p8, %p1019_p2 }
 0x1cd   : > { %p1017_p13 = pneg %p1016_p10 }
 0x1cf   : > { %p1022_p1 = pnand %p1021_p0, %p1017_p13 }
 0x1d1   : > { %1025 = shalt.err (!%p1022_p1)
}
 0x1d2   : > { %859 = dma.vmem_to_hbm [thread:$0]  (%p1178_p9), %s1321_s8, 256, %s1319_s23, %s688_s18  }
 0x1d3 PF: > { %s716_s25 = sand.u32 1, %s1064_s15   ;;  %p869_p3 = pnand %p818_p12, %p1185_p11 }
 0x1d4   : > { %s717_s9 = scalar_lea.sflag [#allocation6], %s716_s25 }
 0x1d5   : > { %p870_p4 = pneg %p869_p3 }
 0x1d7   : > { %1059 = dma.done.wait (%p870_p4), %s717_s9, 256  }
 0x1d8   : > { %1061 = vsyncadd (%p870_p4), %s717_s9, 4294967040  ;;  %s23_s20 = sadd.s32 1, %s1084_s20   ;;  %s1385_s28 = sld [smem:[#allocation13_spill]] }
 0x1d9   : > { %p20_p5 = scmp.ge.s32.totalorder %s23_s20, 4   ;;  %s1386_s17 = sld [smem:[#allocation15_spill]] }
 0x1da   : > { %s1387_s13 = sld [smem:[#allocation14_spill]]  ;;  %s1388_s15 = smov %s1068_s16 }
 0x1db   : > { %s1390_s18 = smov %s1080_s19 }
 0x1dc   :  { %22 = sbr.rel (!%p20_p5) target bundleno = 10 (0xa), region = 94 }
 0x1de   : > { %s1389_s16 = smov %s1385_s28 }
 0x1e0   : > { %s1391_s19 = smov %s1387_s13 }
 0x1e1   :  { %722 = vsyncpa [#allocation5], 1 }
 0x1e2   :  { %724 = vsyncpa [#allocation5 + $0x1], 1 }
 0x1e3   :  { %725 = vsyncpa [#allocation8], 1 }
 0x1e4   :  { %727 = vsyncpa [#allocation8 + $0x1], 1 }
 0x1e5   :  { %728 = vsyncpa [#allocation6], 1 }
 0x1e6   :  { %730 = vsyncpa [#allocation6 + $0x1], 1 }

</bundles_post_ra>
